<compile_context>
chip_gen: v7x
topology: tpu7x:2x2x1
jax: 0.10.0
libtpu: 0.0.40
codegen_flags: <defaults>
</compile_context>

<pallas_src>
import math
import functools

import jax
import jax.numpy as jnp
from jax import lax
from jax.experimental import pallas as pl
from jax.experimental.pallas import tpu as pltpu


# TODO(synk): NUM_CLASSES is not defined in the torch source; 10 used for the demo head.
NUM_CLASSES = 10


# ----------------------------------------------------------------------------
# Parameter / buffer setup (glue, plain JAX — identical math to torch __init__)
# ----------------------------------------------------------------------------
def make_positional_encoding(d_model: int, max_len: int = 5000) -> jnp.ndarray:
    position = jnp.arange(max_len, dtype=jnp.float32)[:, None]            # [max_len, 1]
    div_term = jnp.exp(
        jnp.arange(0, d_model, 2, dtype=jnp.float32)
        * (-math.log(10000.0) / d_model)
    )                                                                     # [d_model/2]
    ang = position * div_term                                             # [max_len, d_model/2]
    pe = jnp.zeros((max_len, d_model), dtype=jnp.float32)
    pe = pe.at[:, 0::2].set(jnp.sin(ang))
    pe = pe.at[:, 1::2].set(jnp.cos(ang))
    return pe                                                             # [max_len, d_model]


# ----------------------------------------------------------------------------
# Kernel 1: positional-encoding add + inverted dropout
# ----------------------------------------------------------------------------
def _pe_kernel(seed_ref, x_ref, pe_ref, o_ref, *, p: float, train: bool,
               tile_elems: int):
    # x_ref / pe_ref / o_ref are (t_r, C) 2-D tiles (batch dim squeezed out of
    # the kernel view) -> plain 2-D VPU add, no broadcast / rank change.
    y = x_ref[...] + pe_ref[...]

    if train and p > 0.0:
        # Portable counter-based PRNG: unique element id = flat-tile-id * tile
        # size + local offset, mixed with the SMEM seed, murmur3-finalized.
        # Pure int32/uint32 VPU ops -> lowers on Mosaic AND in interpret mode
        # (the previous pltpu.prng_* version had no CPU/interpret lowering).
        shape = y.shape
        rows = lax.broadcasted_iota(jnp.int32, shape, 0).astype(jnp.uint32)
        cols = lax.broadcasted_iota(jnp.int32, shape, 1).astype(jnp.uint32)
        flat_tile = pl.program_id(1) * pl.num_programs(0) + pl.program_id(0)
        base = flat_tile.astype(jnp.uint32) * jnp.uint32(tile_elems)
        idx = base + rows * jnp.uint32(shape[1]) + cols
        seed_u = seed_ref[0].astype(jnp.uint32)
        h = idx ^ (seed_u * jnp.uint32(0x9E3779B9))
        h = h ^ (h >> jnp.uint32(16))
        h = h * jnp.uint32(0x85EBCA6B)
        h = h ^ (h >> jnp.uint32(13))
        h = h * jnp.uint32(0xC2B2AE35)
        h = h ^ (h >> jnp.uint32(16))
        thresh = jnp.uint32(min(int(p * float(2 ** 32)), 2 ** 32 - 1))
        keep = h >= thresh
        y = jnp.where(keep, y * (1.0 / (1.0 - p)), jnp.zeros_like(y))

    o_ref[...] = y.astype(o_ref.dtype)


_LANE_CANDIDATES = (4096, 2048, 1024, 512, 256, 128)
# Per-buffer tile target. x/pe/out are each double-buffered -> <= ~6 MiB of
# scoped VMEM total (inside v5e's 16 MiB default and v6e/v7x's 32 MiB).
_TARGET_TILE_BYTES = 1 * 1024 * 1024
# Below this total size the whole problem goes into one grid step / one block.
_TINY_BYTES = 1 * 1024 * 1024


def _choose_layout(S: int, D: int):
    """Present each per-batch (S, D) slab as (R, C) with lane-dense C."""
    if D % 128 == 0:
        return S, D
    N = S * D
    for cand in _LANE_CANDIDATES:
        if N % cand == 0:
            return N // cand, cand
    return S, D  # fallback: masked lane stores, still correct.


def positional_encoding_forward(
    x: jnp.ndarray,
    pe: jnp.ndarray,
    *,
    p: float = 0.1,
    train: bool = False,
    seed: int = 0,
) -> jnp.ndarray:
    """x: [B, S, D]; pe: [max_len, D]. Returns dropout(x + pe[:S]) (torch semantics)."""
    B, S, D = x.shape
    if train and p >= 1.0:
        # torch.nn.Dropout(p=1.0) drops everything.
        return jnp.zeros_like(x)

    pe_2d = pe[:S, :]                                   # [S, D] glue slice
    R, C = _choose_layout(S, D)
    itemsize = x.dtype.itemsize
    x_v = x.reshape(B, R, C)
    pe_v = pe_2d.reshape(R, C)

    total_bytes = B * R * C * itemsize
    if total_bytes <= _TINY_BYTES:
        # Tiny-shape path: collapse batch into rows (pe tiled across batch),
        # one grid step, whole problem resident in VMEM.
        x_v = x_v.reshape(1, B * R, C)
        pe_v = jnp.tile(pe_v, (B, 1))                   # [B*R, C], negligible bytes
        B_eff, R_eff = 1, B * R
        t_r = R_eff
    else:
        B_eff, R_eff = B, R
        budget_rows = max(1, _TARGET_TILE_BYTES // (C * itemsize))
        if budget_rows >= R_eff:
            t_r = R_eff
        else:
            t_r = min(R_eff, max(8, (budget_rows // 8) * 8))

    n_r = -(-R_eff // t_r)                              # cdiv
    kernel = functools.partial(_pe_kernel, p=float(p), train=bool(train),
                               tile_elems=int(t_r * C))

    grid_spec = pltpu.PrefetchScalarGridSpec(
        num_scalar_prefetch=1,                          # seed -> SMEM
        # Row-tiles OUTER, batch INNER: pe's block index only depends on the
        # outer axis, so its tile is not re-DMA'd across consecutive batch steps.
        grid=(n_r, B_eff),
        in_specs=[
            pl.BlockSpec((None, t_r, C), lambda r, b, seed_r: (b, r, 0)),   # x (batch squeezed)
            pl.BlockSpec((t_r, C), lambda r, b, seed_r: (r, 0)),            # pe
        ],
        out_specs=pl.BlockSpec((None, t_r, C), lambda r, b, seed_r: (b, r, 0)),
    )

    out = pl.pallas_call(
        kernel,
        grid_spec=grid_spec,
        out_shape=jax.ShapeDtypeStruct((B_eff, R_eff, C), x.dtype),
        compiler_params=pltpu.CompilerParams(
            # No carried state -> both axes parallel (lets v7x use both TCs).
            dimension_semantics=("parallel", "parallel"),
        ),
    )(jnp.array([seed], dtype=jnp.int32), x_v, pe_v)

    return out.reshape(B, S, D)


# ----------------------------------------------------------------------------
# Kernel 2: mean-pool over sequence + linear classification head
#   output = mean(enc_out, dim=1) @ W^T + b
# ----------------------------------------------------------------------------
def _pool_head_kernel(x_ref, w_ref, b_ref, o_ref, *, inv_s: float):
    # x_ref: (tb, S, D), w_ref: (D, NCpad), b_ref: (1, NCpad), o_ref: (tb, NCpad)
    xm = jnp.sum(x_ref[...], axis=1) * inv_s                         # (tb, D)
    o_ref[...] = (
        jnp.dot(xm, w_ref[...], preferred_element_type=jnp.float32) + b_ref[...]
    ).astype(o_ref.dtype)


def mean_pool_linear_head(x: jnp.ndarray, w: jnp.ndarray, b: jnp.ndarray) -> jnp.ndarray:
    """x: [B, S, D] (encoder output); w: [NC, D] (torch Linear weight); b: [NC]."""
    B, S, D = x.shape
    NC = w.shape[0]
    # Pad the class dim to a multiple of 128 wrapper-side -> lane-dense,
    # unmasked output stores; slice back afterwards (glue).
    NC_pad = max(128, -(-NC // 128) * 128)
    w_t = jnp.zeros((D, NC_pad), w.dtype).at[:, :NC].set(w.T)
    b_p = jnp.zeros((1, NC_pad), b.dtype).at[0, :NC].set(b)

    # Batch tile capped by a ~6 MiB VMEM budget for the (tb, S, D) input tile.
    budget = 6 * 1024 * 1024
    tb = max(1, min(B, budget // max(1, S * D * x.dtype.itemsize)))
    grid = (-(-B // tb),)

    out = pl.pallas_call(
        functools.partial(_pool_head_kernel, inv_s=1.0 / float(S)),
        grid=grid,
        in_specs=[
            pl.BlockSpec((tb, S, D), lambda i: (i, 0, 0)),
            pl.BlockSpec((D, NC_pad), lambda i: (0, 0)),
            pl.BlockSpec((1, NC_pad), lambda i: (0, 0)),
        ],
        out_specs=pl.BlockSpec((tb, NC_pad), lambda i: (i, 0)),
        out_shape=jax.ShapeDtypeStruct((B, NC_pad), x.dtype),
        compiler_params=pltpu.CompilerParams(dimension_semantics=("parallel",)),
    )(x, w_t, b_p)
    return out[:, :NC]


# ----------------------------------------------------------------------------
# Demo / correctness checks
# ----------------------------------------------------------------------------
if __name__ == "__main__":
    key = jax.random.PRNGKey(0)

    # Small demo shape consistent with the module (batch-first [B, S, D]).
    B, S, D = 2, 8, 32
    x = jax.random.normal(key, (B, S, D), dtype=jnp.float32)
    pe = make_positional_encoding(d_model=D, max_len=5000)

    # Eval mode (dropout = identity), matches the torch module in .eval().
    out = jax.block_until_ready(positional_encoding_forward(x, pe, p=0.1, train=False))
    ref = x + pe[None, :S, :]
    assert out.shape == (B, S, D)
    assert jnp.allclose(out, ref, atol=1e-6, rtol=1e-6)

    # Train-mode smoke test: every element is either dropped (0) or scaled.
    p_drop = 0.25
    out_tr = jax.block_until_ready(
        positional_encoding_forward(x, pe, p=p_drop, train=True, seed=123))
    scaled = ref / (1.0 - p_drop)
    is_zero = jnp.isclose(out_tr, 0.0, atol=1e-6)
    is_scaled = jnp.isclose(out_tr, scaled, atol=1e-5, rtol=1e-5)
    assert bool(jnp.all(is_zero | is_scaled))
    assert bool(jnp.any(is_zero)) and bool(jnp.any(is_scaled))   # mask not degenerate

    # Classification head kernel (mean over seq + Linear).  In the full model
    # this consumes the TransformerEncoder output; the encoder stack itself is
    # not reimplemented here (see TODO at top), so we test the kernel on the
    # positional-encoding output as a stand-in input.
    kw, kb = jax.random.split(jax.random.PRNGKey(1))
    w_head = jax.random.uniform(kw, (NUM_CLASSES, D), jnp.float32, -0.1, 0.1)
    b_head = jnp.zeros((NUM_CLASSES,), jnp.float32)
    logits = jax.block_until_ready(mean_pool_linear_head(out, w_head, b_head))
    ref_logits = out.mean(axis=1) @ w_head.T + b_head
    assert logits.shape == (B, NUM_CLASSES)
    assert jnp.allclose(logits, ref_logits, atol=1e-5, rtol=1e-5)

    # Exercise the tiled (non-tiny) positional-encoding paths too:
    #   (2, 5000, 128): lane-aligned D, multi-row-tile grid with a partial edge tile.
    #   (4, 2048,  80): D not a multiple of 128 -> lane-densified flattened layout.
    for (b2, s2, d2) in ((2, 5000, 128), (4, 2048, 80)):
        x2 = jax.random.normal(jax.random.PRNGKey(2), (b2, s2, d2), dtype=jnp.float32)
        pe2 = make_positional_encoding(d_model=d2, max_len=max(5000, s2))
        o2 = jax.block_until_ready(
            positional_encoding_forward(x2, pe2, p=0.1, train=False))
        r2 = x2 + pe2[None, :s2, :]
        assert jnp.allclose(o2, r2, atol=1e-6, rtol=1e-6)

    print("KERNEL_OK")
</pallas_src>

<mosaic_0001>
module attributes {stable_mosaic.version = 11 : i64} {
  func.func @_pe_kernel(%arg0: i32, %arg1: i32, %arg2: memref<1xi32, #tpu.memory_space<smem>>, %arg3: memref<1x2x256xf32, #tpu.memory_space<vmem>>, %arg4: memref<2x256xf32, #tpu.memory_space<vmem>>, %arg5: memref<1x2x256xf32, #tpu.memory_space<vmem>>) attributes {dimension_semantics = [#tpu.dimension_semantics<parallel>, #tpu.dimension_semantics<parallel>], iteration_bounds = array<i64: 1, 1>, scalar_prefetch = 1 : i64, scratch_operands = 0 : i64, tpu.core_type = #tpu.core_type<tc>, window_params = [{transform_indices = @transform_0, window_bounds = array<i64: 1, 2, 256>}, {transform_indices = @transform_1, window_bounds = array<i64: 2, 256>}, {transform_indices = @transform_2, window_bounds = array<i64: 1, 2, 256>}]} {
    %c0 = arith.constant 0 : index
    %c0_0 = arith.constant 0 : index
    %c0_1 = arith.constant 0 : index
    %0 = vector.load %arg3[%c0, %c0_0, %c0_1] : memref<1x2x256xf32, #tpu.memory_space<vmem>>, vector<1x2x256xf32>
    %1 = vector.shape_cast %0 : vector<1x2x256xf32> to vector<2x256xf32>
    %c0_2 = arith.constant 0 : index
    %c0_3 = arith.constant 0 : index
    %2 = vector.load %arg4[%c0_2, %c0_3] : memref<2x256xf32, #tpu.memory_space<vmem>>, vector<2x256xf32>
    %3 = arith.addf %1, %2 : vector<2x256xf32>
    %c0_4 = arith.constant 0 : index
    %c0_5 = arith.constant 0 : index
    %c0_6 = arith.constant 0 : index
    %4 = vector.load %arg5[%c0_4, %c0_5, %c0_6] : memref<1x2x256xf32, #tpu.memory_space<vmem>>, vector<1x2x256xf32>
    %5 = vector.shape_cast %4 : vector<1x2x256xf32> to vector<2x256xf32>
    %6 = vector.shape_cast %3 : vector<2x256xf32> to vector<1x2x256xf32>
    tpu.vector_store %arg5[%c0_4, %c0_5, %c0_6], %6 {strides = array<i32>} : memref<1x2x256xf32, #tpu.memory_space<vmem>>, vector<1x2x256xf32>,
    return
  }
  func.func @transform_0(%arg0: i32, %arg1: i32, %arg2: memref<1xi32, #tpu.memory_space<smem>>) -> (i32, i32, i32) {
    %c0_i32 = arith.constant 0 : i32
    %c0_i32_0 = arith.constant 0 : i32
    return %arg1, %arg0, %c0_i32 : i32, i32, i32
  }
  func.func @transform_1(%arg0: i32, %arg1: i32, %arg2: memref<1xi32, #tpu.memory_space<smem>>) -> (i32, i32) {
    %c0_i32 = arith.constant 0 : i32
    %c0_i32_0 = arith.constant 0 : i32
    return %arg0, %c0_i32 : i32, i32
  }
  func.func @transform_2(%arg0: i32, %arg1: i32, %arg2: memref<1xi32, #tpu.memory_space<smem>>) -> (i32, i32, i32) {
    %c0_i32 = arith.constant 0 : i32
    %c0_i32_0 = arith.constant 0 : i32
    return %arg1, %arg0, %c0_i32 : i32, i32, i32
  }
}

</mosaic_0001>

<bundles_post_ra>
// kernel: tpu_custom_call.1
= control target key start
LH: loop header
LB: loop body
LE: loop exit
PB: predicated region body
PF: predicated region fallthrough
CT: control target
= control target key end

     0   :  { %9 = vsyncpa [#allocation5], 0  ;;  %s144_s0 = inlined_call_operand.<no memory space> [shape: s32[1], index: 0, kind: input, shape index: {}]   ;;  %s145_s1 = inlined_call_operand.hbm [shape: f32[1,2,256], index: 1, kind: input, shape index: {}]   ;;  %s146_s2 = inlined_call_operand.vmem [shape: f32[2,256], index: 2, kind: input, shape index: {}]   ;;  %s147_s3 = inlined_call_operand.hbm [shape: f32[1,2,256], index: 3, kind: output, shape index: {}]  }
   0x1   :  { %10 = vsyncpa [#allocation6], 0  ;;  %s95_s12 = smov [#allocation4]   ;;  %s47_s16 = scalar_lea.hbm %s145_s1, 64 }
   0x2   :  { %s17_s13 = sshll.u32 %s95_s12, 4  ;;  %p48_p0 = scmp.ne.s32.totalorder %s145_s1, %s47_s16  ;;  %s18_s13 = int_to_ptr.vmem [resolvable:$true] %s17_s13 }
   0x3   :  { %p51_p1 = scmp.lt.u32.totalorder %s47_s16, %s145_s1 }
   0x5   :  { %p53_p2 = pnand %p51_p1, %p48_p0 }
   0x7   :  { %56 = shalt.err (!%p53_p2)
}
   0x8   :  { %s57_s20 = scalar_lea.vmem %s18_s13, 64  ;;  %p62_p4 = scmp.lt.s32.totalorder %s18_s13, %s18_s13 }
   0x9   :  { %p58_p3 = scmp.ne.s32.totalorder %s18_s13, %s57_s20  ;;  %p63_p5 = scmp.lt.s32.totalorder %s57_s20, %s57_s20 }
   0xb   :  { %p64_p6 = por %p63_p5, %p62_p4 }
   0xd   :  { %p65_p7 = pnand %p64_p6, %p58_p3 }
   0xf   :  { %68 = shalt.err (!%p65_p7)
}
  0x10   :  { %20 = dma.hbm_to_vmem [thread:$0]  %s145_s1, 64, %s18_s13, [#allocation5]  }
  0x11   :  { %91 = dma.done.wait [#allocation5], 64  }
  0x12   :  { %92 = vsyncadd [#allocation5], 4294967232  ;;  %s96_s23 = smov [#allocation7]   ;;  %v26_v0 = vld [vmem:[#allocation4] sm:$0xf] }
  0x13   :  { %s36_s24 = sshll.u32 %s96_s23, 4  ;;  %v27_v1 = vld [vmem:[%s146_s2] sm:$0xf]  ;;  %s37_s24 = int_to_ptr.vmem [resolvable:$true] %s36_s24 }
  0x14   :  { %v28_v2 = vadd.f32 %v27_v1, %v26_v0  ;;  %s69_s27 = scalar_lea.vmem %s37_s24, 64  ;;  %p74_p9 = scmp.lt.s32.totalorder %s37_s24, %s37_s24 }
  0x15   :  { %p70_p8 = scmp.ne.s32.totalorder %s37_s24, %s69_s27  ;;  %p75_p10 = scmp.lt.s32.totalorder %s69_s27, %s69_s27 }
  0x16   :  { %29 = vst [vmem:[#allocation7] sm:$0xf] %v28_v2 }
  0x17   :  { %p76_p11 = por %p75_p10, %p74_p9 }
  0x19   :  { %p77_p12 = pnand %p76_p11, %p70_p8 }
  0x1b   :  { %80 = shalt.err (!%p77_p12)
}
  0x1c   :  { %s81_s29 = scalar_lea.hbm %s147_s3, 64 }
  0x1d   :  { %p82_p13 = scmp.ne.s32.totalorder %s147_s3, %s81_s29  ;;  %p85_p0 = scmp.lt.u32.totalorder %s81_s29, %s147_s3 }
  0x1f   :  { %p87_p1 = pnand %p85_p0, %p82_p13 }
  0x21   :  { %90 = shalt.err (!%p87_p1)
}
  0x22   :  { %39 = dma.vmem_to_hbm [thread:$0]  %s37_s24, 64, %s147_s3, [#allocation6]  }
  0x23   :  { %93 = dma.done.wait [#allocation6], 64  }
  0x24   :  { %94 = vsyncadd [#allocation6], 4294967232 }
  0x25   :  { %43 = vsyncpa [#allocation5], 1 }
  0x26   :  { %44 = vsyncpa [#allocation6], 1 }

</bundles_post_ra>
